<compile_context>
chip_gen: v7x
topology: tpu7x:2x2x1
jax: 0.10.0
libtpu: 0.0.40
codegen_flags: <defaults>
</compile_context>

<pallas_src>
import jax
import jax.numpy as jnp
from jax.experimental import pallas as pl
from jax.experimental.pallas import tpu as pltpu


def _sigmoid_kernel(x_ref, o_ref):
    # Upcast to f32 so half-precision inputs match torch.sigmoid's internal
    # precision; tanh runs on the EUP slot (free w.r.t. the VALU / DMA).
    x = x_ref[...].astype(jnp.float32)
    y = 0.5 * (jnp.tanh(0.5 * x) + 1.0)
    o_ref[...] = y.astype(o_ref.dtype)


_LANE_CANDIDATES = (4096, 2048, 1024, 512, 256, 128)   # lane-dense last dims
_SUBLANE_BY_ITEMSIZE = {4: 8, 2: 16, 1: 32}             # min sublane multiple
_MIN_SPLIT_BYTES = 4 << 20                               # force grid>=2 above this


def _vmem_capacity_bytes() -> int:
    """Queried per-TensorCore VMEM capacity, conservative fallback (v7x)."""
    try:
        return int(pltpu.get_tpu_info().vmem_capacity_bytes)
    except Exception:  # pragma: no cover - query unavailable
        return 64 << 20


def _sigmoid_2d(x2d: jax.Array, sub: int) -> jax.Array:
    """Run the Pallas sigmoid over a lane-dense (rows, lane) array."""
    rows, lane = x2d.shape
    dtype = x2d.dtype
    itemsize = jnp.dtype(dtype).itemsize

    vmem_cap = _vmem_capacity_bytes()
    # ~VMEM/8 per block: 8 MiB on 64 MiB parts, 16 MiB on 128 MiB parts.
    target_block_bytes = min(max(vmem_cap // 8, 2 << 20), 16 << 20)
    target_rows = max(sub, (target_block_bytes // (lane * itemsize) // sub) * sub)
    total_bytes = rows * lane * itemsize

    if rows <= target_rows:
        if total_bytes > _MIN_SPLIT_BYTES and rows > 2 * sub:
            # Would otherwise be a single block: halve it so grid >= 2 and the
            # parallel axis can shard across both v7x TensorCores.
            half = (rows + 1) // 2
            block_rows = ((half + sub - 1) // sub) * sub
            if block_rows >= rows:
                block_rows = rows
        else:
            block_rows = rows            # full-dim block: always layout-legal
    else:
        block_rows = target_rows         # multiple of sub; partial last block OK

    grid = (pl.cdiv(rows, block_rows),)
    block_bytes = block_rows * lane * itemsize
    # Double-buffered input + output = 4x block bytes, plus headroom; never
    # commit more than 75% of the queried per-core VMEM.
    vmem_limit = int(min(max(4 * block_bytes + (4 << 20), 32 << 20),
                         (3 * vmem_cap) // 4))

    return pl.pallas_call(
        _sigmoid_kernel,
        out_shape=jax.ShapeDtypeStruct((rows, lane), dtype),
        grid_spec=pltpu.PrefetchScalarGridSpec(
            num_scalar_prefetch=0,
            grid=grid,
            in_specs=[pl.BlockSpec((block_rows, lane), lambda i: (i, 0))],
            out_specs=pl.BlockSpec((block_rows, lane), lambda i: (i, 0)),
        ),
        compiler_params=pltpu.CompilerParams(
            dimension_semantics=("parallel",),
            vmem_limit_bytes=vmem_limit,
        ),
    )(x2d)


def pallas_sigmoid(x: jax.Array) -> jax.Array:
    """Elementwise sigmoid via Pallas. Accepts any shape float array."""
    orig_shape = x.shape
    dtype = x.dtype
    n = x.size
    if n == 0:
        return x

    itemsize = jnp.dtype(dtype).itemsize
    sub = _SUBLANE_BY_ITEMSIZE.get(itemsize, 8)
    x_flat = jnp.ravel(x)

    divisible = [c for c in _LANE_CANDIDATES if n % c == 0]
    if divisible:
        # Widest lane that still fills the sublanes (rows >= sub); for tiny
        # inputs just take the widest dividing lane (single full-array block).
        full = [c for c in divisible if n // c >= sub]
        lane = full[0] if full else divisible[0]
        out_flat = _sigmoid_2d(x_flat.reshape(n // lane, lane), sub).reshape(-1)
    else:
        # Rare: flat size not a multiple of 128. Kernel on the aligned prefix,
        # tiny (<128-element) tail in plain JAX -- no full-array padding copy.
        n_main = (n // 128) * 128
        tail = jax.nn.sigmoid(x_flat[n_main:].astype(jnp.float32)).astype(dtype)
        if n_main == 0:
            out_flat = tail
        else:
            main = _sigmoid_2d(
                x_flat[:n_main].reshape(n_main // 128, 128), sub).reshape(-1)
            out_flat = jnp.concatenate([main, tail])

    return out_flat.reshape(orig_shape)


# TODO(synk): backward() and the FloatTensor input-type validation of the
# original module are not part of the forward pass and are not implemented.


if __name__ == "__main__":
    key = jax.random.PRNGKey(0)
    # Small NCHW input consistent with a typical conv-net activation.
    x = jax.random.normal(key, (2, 4, 16, 16), dtype=jnp.float32)

    out = pallas_sigmoid(x)
    jax.block_until_ready(out)

    ref = jax.nn.sigmoid(x)
    assert out.shape == x.shape and out.dtype == x.dtype
    assert jnp.allclose(out, ref, atol=1e-6, rtol=1e-6)

    # Numerical-stability sanity check: large |x| must not produce NaN/Inf.
    x_big = jnp.array([[-100.0, -50.0, -1.0, 0.0] * 32,
                       [1.0, 50.0, 88.8, 100.0] * 32,
                       [0.5, -0.5, 2.0, -2.0] * 32,
                       [10.0, -10.0, 30.0, -30.0] * 32], dtype=jnp.float32)
    out_big = pallas_sigmoid(x_big)
    jax.block_until_ready(out_big)
    assert jnp.all(jnp.isfinite(out_big))
    assert jnp.allclose(out_big, jax.nn.sigmoid(x_big), atol=1e-6, rtol=1e-6)

    # Non-128-multiple flat size exercises the aligned-prefix + tail path.
    x_odd = jax.random.normal(jax.random.PRNGKey(1), (7, 19), dtype=jnp.float32)
    out_odd = pallas_sigmoid(x_odd)
    jax.block_until_ready(out_odd)
    assert jnp.allclose(out_odd, jax.nn.sigmoid(x_odd), atol=1e-6, rtol=1e-6)

    print("KERNEL_OK")
</pallas_src>

<mosaic_0001>
module attributes {stable_mosaic.version = 11 : i64} {
  func.func @_sigmoid_kernel(%arg0: i32, %arg1: memref<8x256xf32, #tpu.memory_space<vmem>>, %arg2: memref<8x256xf32, #tpu.memory_space<vmem>>) attributes {dimension_semantics = [#tpu.dimension_semantics<parallel>], iteration_bounds = array<i64: 1>, scalar_prefetch = 0 : i64, scratch_operands = 0 : i64, tpu.core_type = #tpu.core_type<tc>, window_params = [{transform_indices = @transform_0, window_bounds = array<i64: 8, 256>}, {transform_indices = @transform_1, window_bounds = array<i64: 8, 256>}]} {
    %c0 = arith.constant 0 : index
    %c0_0 = arith.constant 0 : index
    %0 = vector.load %arg1[%c0, %c0_0] : memref<8x256xf32, #tpu.memory_space<vmem>>, vector<8x256xf32>
    %cst = arith.constant 5.000000e-01 : f32
    %1 = vector.broadcast %cst : f32 to vector<8x256xf32>
    %2 = arith.mulf %1, %0 : vector<8x256xf32>
    %3 = math.tanh %2 : vector<8x256xf32>
    %cst_1 = arith.constant 1.000000e+00 : f32
    %4 = vector.broadcast %cst_1 : f32 to vector<8x256xf32>
    %5 = arith.addf %3, %4 : vector<8x256xf32>
    %cst_2 = arith.constant 5.000000e-01 : f32
    %6 = vector.broadcast %cst_2 : f32 to vector<8x256xf32>
    %7 = arith.mulf %6, %5 : vector<8x256xf32>
    %c0_3 = arith.constant 0 : index
    %c0_4 = arith.constant 0 : index
    %8 = vector.load %arg2[%c0_3, %c0_4] : memref<8x256xf32, #tpu.memory_space<vmem>>, vector<8x256xf32>
    tpu.vector_store %arg2[%c0_3, %c0_4], %7 {strides = array<i32>} : memref<8x256xf32, #tpu.memory_space<vmem>>, vector<8x256xf32>,
    return
  }
  func.func @transform_0(%arg0: i32) -> (i32, i32) {
    %c0_i32 = arith.constant 0 : i32
    %c0_i32_0 = arith.constant 0 : i32
    return %arg0, %c0_i32 : i32, i32
  }
  func.func @transform_1(%arg0: i32) -> (i32, i32) {
    %c0_i32 = arith.constant 0 : i32
    %c0_i32_0 = arith.constant 0 : i32
    return %arg0, %c0_i32 : i32, i32
  }
}

</mosaic_0001>

<bundles_post_ra>
// kernel: tpu_custom_call.1
= control target key start
LH: loop header
LB: loop body
LE: loop exit
PB: predicated region body
PF: predicated region fallthrough
CT: control target
= control target key end

     0   :  { %6 = vsyncpa [#allocation3], 0  ;;  %s138_s0 = inlined_call_operand.hbm [shape: f32[8,256], index: 0, kind: input, shape index: {}]   ;;  %s139_s1 = inlined_call_operand.hbm [shape: f32[8,256], index: 1, kind: output, shape index: {}]  }
   0x1   :  { %7 = vsyncpa [#allocation4], 0  ;;  %s102_s6 = smov [#allocation2]   ;;  %s54_s10 = scalar_lea.hbm %s138_s0, 256 }
   0x2   :  { %s14_s7 = sshll.u32 %s102_s6, 4  ;;  %p55_p0 = scmp.ne.s32.totalorder %s138_s0, %s54_s10  ;;  %s15_s7 = int_to_ptr.vmem [resolvable:$true] %s14_s7 }
   0x3   :  { %p58_p1 = scmp.lt.u32.totalorder %s54_s10, %s138_s0 }
   0x5   :  { %p60_p2 = pnand %p58_p1, %p55_p0 }
   0x7   :  { %63 = shalt.err (!%p60_p2)
}
   0x8   :  { %s64_s15 = scalar_lea.vmem %s15_s7, 256  ;;  %p69_p4 = scmp.lt.s32.totalorder %s15_s7, %s15_s7 }
   0x9   :  { %p65_p3 = scmp.ne.s32.totalorder %s15_s7, %s64_s15  ;;  %p70_p5 = scmp.lt.s32.totalorder %s64_s15, %s64_s15 }
   0xb   :  { %p71_p6 = por %p70_p5, %p69_p4 }
   0xd   :  { %p72_p7 = pnand %p71_p6, %p65_p3 }
   0xf   :  { %75 = shalt.err (!%p72_p7)
}
  0x10   :  { %17 = dma.hbm_to_vmem [thread:$0]  %s138_s0, 256, %s15_s7, [#allocation3]  }
  0x11   :  { %98 = dma.done.wait [#allocation3], 256  }
  0x12   :  { %99 = vsyncadd [#allocation3], 4294967040  ;;  %v21_v0 = vld [vmem:[#allocation2] sm:$0xff]  ;;  %v22_v1 = vld [vmem:[#allocation2 + $0x8] sm:$0xff]  ;;  %s103_s18 = smov [#allocation5]  }
  0x13   :  { %v23_v2 = vmul.f32 0.5, %v21_v0  ;;  %v24_v3 = vmul.f32 0.5, %v22_v1  ;;  %s39_s19 = sshll.u32 %s103_s18, 4  ;;  %s40_s19 = int_to_ptr.vmem [resolvable:$true] %s39_s19 }
  0x14   :  { %s76_s0 = scalar_lea.vmem %s40_s19, 256  ;;  %p81_p9 = scmp.lt.s32.totalorder %s40_s19, %s40_s19 }
  0x15   :  { %50 = vtanh.f32 %v23_v2  ;;  %p77_p8 = scmp.ne.s32.totalorder %s40_s19, %s76_s0  ;;  %p82_p10 = scmp.lt.s32.totalorder %s76_s0, %s76_s0 }
  0x16   :  { %52 = vtanh.f32 %v24_v3 }
  0x17   :  { %p83_p11 = por %p82_p10, %p81_p9 }
  0x19   :  { %p84_p12 = pnand %p83_p11, %p77_p8 }
  0x1f   :  { %v51_v4 = vpop.eup %50 }
  0x20   :  { %v53_v5 = vpop.eup %52  ;;  %v27_v6 = vadd.f32 1.0, %v51_v4 }
  0x21   :  { %v28_v7 = vadd.f32 1.0, %v53_v5 }
  0x22   :  { %v29_v8 = vmul.f32 0.5, %v27_v6 }
  0x23   :  { %v30_v9 = vmul.f32 0.5, %v28_v7 }
  0x24   :  { %31 = vst [vmem:[#allocation5] sm:$0xff] %v29_v8 }
  0x25   :  { %32 = vst [vmem:[#allocation5 + $0x8] sm:$0xff] %v30_v9 }
  0x26   :  { %87 = shalt.err (!%p84_p12)
}
  0x27   :  { %s88_s22 = scalar_lea.hbm %s139_s1, 256 }
  0x28   :  { %p89_p13 = scmp.ne.s32.totalorder %s139_s1, %s88_s22  ;;  %p92_p0 = scmp.lt.u32.totalorder %s88_s22, %s139_s1 }
  0x2a   :  { %p94_p1 = pnand %p92_p0, %p89_p13 }
  0x2c   :  { %97 = shalt.err (!%p94_p1)
}
  0x2d   :  { %42 = dma.vmem_to_hbm [thread:$0]  %s40_s19, 256, %s139_s1, [#allocation4]  }
  0x2e   :  { %100 = dma.done.wait [#allocation4], 256  }
  0x2f   :  { %101 = vsyncadd [#allocation4], 4294967040 }
  0x30   :  { %46 = vsyncpa [#allocation3], 1 }
  0x31   :  { %47 = vsyncpa [#allocation4], 1 }

</bundles_post_ra>
